<compile_context>
chip_gen: v5e
topology: v5e:2x2
jax: 0.10.0
libtpu: 0.0.40
codegen_flags: <defaults>
</compile_context>

<pallas_src>
import functools

import jax
import jax.numpy as jnp
from jax.experimental import pallas as pl
from jax.experimental.pallas import tpu as pltpu

EPS = 1e-5  # nn.BatchNorm2d default


def _round_up(x, m):
    return (x + m - 1) // m * m


def _vmem_limit_bytes(need_bytes):
    cap = 32 << 20                       # conservative cap: valid even on v7x (64 MiB VMEM)
    try:                                 # v5e/v6e (128 MiB VMEM): allow larger blocks
        phys = int(pltpu.get_tpu_info().vmem_capacity_bytes)
        cap = min(max(cap, phys // 2), 64 << 20)
    except Exception:
        pass
    return int(max(16 << 20, min(need_bytes, cap)))


# -----------------------------------------------------------------------------
# Fused kernel: conv (single K=Cin*KH*KW dot per image) + BN stats accumulation,
# with BN fold + ReLU applied in place on the VMEM-resident output at the end.
# -----------------------------------------------------------------------------
def _conv_bn_relu_kernel(x_ref, w_ref, gamma_ref, beta_ref, out_ref,
                         sum_ref, sq_ref, *, NB, KH, KW, W, OW, L, m_valid):
    # x_ref     : (NB, Cin, H*W)     f32   flattened images for this grid step
    # w_ref     : (Cout, KH*KW*Cin)  bf16  taps-major reshaped conv weight
    # gamma/beta: (Cout, 1)          f32
    # out_ref   : (N, Cout, L_pad)   f32   resident across the whole grid
    # sum/sq_ref: (Cout, 1)          f32   per-channel BN partial accumulators
    g = pl.program_id(0)

    @pl.when(g == 0)
    def _init():
        out_ref[...] = jnp.zeros_like(out_ref)
        sum_ref[...] = jnp.zeros_like(sum_ref)
        sq_ref[...] = jnp.zeros_like(sq_ref)

    w2 = w_ref[...]                                            # (Cout, KH*KW*Cin)
    # Valid output columns of a length-L conv row: (col % W) < OW.
    col = jax.lax.broadcasted_iota(jnp.int32, (1, L), 1)
    mask = ((col % W) < OW).astype(jnp.float32)                # (1, L)

    s_acc = jnp.zeros_like(sum_ref[...])
    q_acc = jnp.zeros_like(sq_ref[...])
    for i in range(NB):                                        # NB small & static
        xi = x_ref[i].astype(jnp.bfloat16)                     # in-kernel cast (no wrapper pass)
        # Stack the KH*KW lane-shifted taps -> (KH*KW*Cin, L): one MXU contraction.
        taps = jnp.concatenate(
            [xi[:, kh * W + kw: kh * W + kw + L]
             for kh in range(KH) for kw in range(KW)], axis=0)
        y = jnp.dot(w2, taps, preferred_element_type=jnp.float32)   # (Cout, L) f32
        m = y * mask
        s_acc = s_acc + jnp.sum(m, axis=1, keepdims=True)
        q_acc = q_acc + jnp.sum(m * m, axis=1, keepdims=True)
        # Store into the resident output block; the HBM writeback happens only once,
        # lane-dense, after the final grid step.
        out_ref[pl.ds(g * NB + i, 1), :, :L] = y[None]
    sum_ref[...] += s_acc
    sq_ref[...] += q_acc

    @pl.when(g == pl.num_programs(0) - 1)
    def _finalize():
        # TODO(synk): one-pass E[x^2]-E[x]^2 variance in f32; switch to Welford /
        # two-pass partials before scaling to very large batch*spatial.
        inv_n = 1.0 / float(m_valid)
        mean = sum_ref[...] * inv_n                            # (Cout, 1)
        var = sq_ref[...] * inv_n - mean * mean                # biased (train-mode)
        scale = gamma_ref[...] * jax.lax.rsqrt(var + EPS)      # (Cout, 1)
        shift = beta_ref[...] - mean * scale
        y_all = out_ref[...]                                   # (N, Cout, L_pad) f32
        out_ref[...] = jnp.maximum(y_all * scale[None] + shift[None], 0.0)


# -----------------------------------------------------------------------------
# Wrapper
# -----------------------------------------------------------------------------
@jax.jit
def conv_block(x_nchw, weight, bias, gamma, beta):
    """ReLU(BatchNorm2d(Conv2d(x))) with training-mode batch statistics.

    `bias` is accepted for API parity with nn.Conv2d but intentionally unused: a
    per-channel pre-BN bias shifts the batch mean by the same amount and cancels
    exactly under training-mode BatchNorm.  (It would NOT cancel in eval mode with
    running statistics -- guard before reusing this kernel there.)
    """
    del bias
    N, Cin, H, W = x_nchw.shape
    Cout, _, KH, KW = weight.shape
    OH, OW = H - KH + 1, W - KW + 1          # stride=1, padding=0 (Conv2d defaults)
    L = (OH - 1) * W + OW                    # conv row width; last tap slice ends at H*W
    L_pad = _round_up(OH * W, 128)           # lane-dense output rows (>= OH*W for reshape)
    M = N * OH * OW                          # BN sample count per channel

    # Images per grid step: biggest divisor of N whose block stays modest, so each
    # step moves enough data to amortize the ~0.35us per-step overhead.
    per_img = Cin * H * W * 4 + Cout * L_pad * 4
    NB = 1
    for cand in range(N, 0, -1):
        if N % cand == 0 and (cand == 1 or cand * per_img <= (1 << 20)):
            NB = cand
            break
    G = N // NB

    resident = N * Cout * L_pad * 4          # f32 conv/output slab kept in VMEM
    # TODO(synk): two-kernel spill path (conv+stats, then scale/shift+ReLU) with halo
    # row-tiling for conv intermediates that do not fit resident VMEM (esp. v7x 64 MiB).
    if resident > (20 << 20):
        raise NotImplementedError(
            "conv intermediate too large for the fused VMEM-resident path")

    x2d = x_nchw.reshape(N, Cin, H * W)                                   # f32, no pad/cast
    w2 = jnp.transpose(weight, (0, 2, 3, 1)).reshape(Cout, KH * KW * Cin)
    w2 = w2.astype(jnp.bfloat16)                                          # tiny
    gamma2 = gamma.reshape(Cout, 1).astype(jnp.float32)
    beta2 = beta.reshape(Cout, 1).astype(jnp.float32)

    need = 2 * NB * Cin * H * W * 4 + resident + Cout * KH * KW * Cin * 2 + (4 << 20)

    y = pl.pallas_call(
        functools.partial(_conv_bn_relu_kernel, NB=NB, KH=KH, KW=KW, W=W, OW=OW,
                          L=L, m_valid=M),
        out_shape=jax.ShapeDtypeStruct((N, Cout, L_pad), jnp.float32),
        grid_spec=pltpu.PrefetchScalarGridSpec(
            num_scalar_prefetch=0,
            grid=(G,),
            in_specs=[
                pl.BlockSpec((NB, Cin, H * W), lambda g: (g, 0, 0)),
                pl.BlockSpec((Cout, KH * KW * Cin), lambda g: (0, 0)),
                pl.BlockSpec((Cout, 1), lambda g: (0, 0)),
                pl.BlockSpec((Cout, 1), lambda g: (0, 0)),
            ],
            # Constant index map -> whole output stays resident in VMEM and is written
            # back to HBM once, after the final (BN+ReLU) step.
            out_specs=pl.BlockSpec((N, Cout, L_pad), lambda g: (0, 0, 0)),
            scratch_shapes=[pltpu.VMEM((Cout, 1), jnp.float32),
                            pltpu.VMEM((Cout, 1), jnp.float32)]),
        compiler_params=pltpu.CompilerParams(
            # Resident output + stats accumulation across steps -> "arbitrary".
            dimension_semantics=("arbitrary",),
            vmem_limit_bytes=_vmem_limit_bytes(need)),
    )(x2d, w2, gamma2, beta2)

    # Rows are already NCHW-ordered: reshape and drop the invalid tail columns.
    return y[:, :, :OH * W].reshape(N, Cout, OH, W)[:, :, :, :OW]


# -----------------------------------------------------------------------------
# Pure-JAX reference (matches PyTorch ConvBlock forward in training mode)
# -----------------------------------------------------------------------------
def conv_block_ref(x, weight, bias, gamma, beta):
    y = jax.lax.conv_general_dilated(
        x, weight, window_strides=(1, 1), padding="VALID",
        dimension_numbers=("NCHW", "OIHW", "NCHW"))
    y = y + bias[None, :, None, None]
    mean = jnp.mean(y, axis=(0, 2, 3), keepdims=True)
    var = jnp.mean((y - mean) ** 2, axis=(0, 2, 3), keepdims=True)  # biased
    y = (y - mean) * jax.lax.rsqrt(var + EPS)
    y = y * gamma[None, :, None, None] + beta[None, :, None, None]
    return jnp.maximum(y, 0.0)


if __name__ == "__main__":
    key = jax.random.PRNGKey(0)
    N, Cin, H, W = 2, 4, 16, 16
    Cout, KH, KW = 8, 3, 3

    k1, k2, k3 = jax.random.split(key, 3)
    x = jax.random.normal(k1, (N, Cin, H, W), dtype=jnp.float32)
    weight = jax.random.normal(k2, (Cout, Cin, KH, KW), dtype=jnp.float32) * 0.1
    bias = jax.random.normal(k3, (Cout,), dtype=jnp.float32) * 0.1
    gamma = jnp.ones((Cout,), dtype=jnp.float32)   # nn.BatchNorm2d default init
    beta = jnp.zeros((Cout,), dtype=jnp.float32)

    out = conv_block(x, weight, bias, gamma, beta)
    out = jax.block_until_ready(out)

    ref = conv_block_ref(x, weight, bias, gamma, beta)
    assert out.shape == ref.shape == (N, Cout, H - KH + 1, W - KW + 1)
    # bf16 MXU inputs -> looser tolerance than pure f32.
    max_err = float(jnp.max(jnp.abs(out - ref)))
    assert jnp.allclose(out, ref, atol=5e-2, rtol=5e-2), max_err

    print("KERNEL_OK")
</pallas_src>

<mosaic_0001>
module attributes {stable_mosaic.version = 11 : i64} {
  func.func @_conv_bn_relu_kernel(%arg0: i32, %arg1: memref<2x4x256xf32, #tpu.memory_space<vmem>>, %arg2: memref<8x36xbf16, #tpu.memory_space<vmem>>, %arg3: memref<8x1xf32, #tpu.memory_space<vmem>>, %arg4: memref<8x1xf32, #tpu.memory_space<vmem>>, %arg5: memref<2x8x256xf32, #tpu.memory_space<vmem>>, %arg6: memref<8x1xf32, #tpu.memory_space<vmem>>, %arg7: memref<8x1xf32, #tpu.memory_space<vmem>>) attributes {dimension_semantics = [#tpu.dimension_semantics<arbitrary>], iteration_bounds = array<i64: 1>, scalar_prefetch = 0 : i64, scratch_operands = 2 : i64, tpu.core_type = #tpu.core_type<tc>, window_params = [{transform_indices = @transform_0, window_bounds = array<i64: 2, 4, 256>}, {pipeline_mode = #tpu.pipeline_mode<synchronous>, transform_indices = @transform_1, window_bounds = array<i64: 8, 36>}, {pipeline_mode = #tpu.pipeline_mode<synchronous>, transform_indices = @transform_2, window_bounds = array<i64: 8, 1>}, {pipeline_mode = #tpu.pipeline_mode<synchronous>, transform_indices = @transform_3, window_bounds = array<i64: 8, 1>}, {pipeline_mode = #tpu.pipeline_mode<synchronous>, transform_indices = @transform_4, window_bounds = array<i64: 2, 8, 256>}]} {
    %c0_i32 = arith.constant 0 : i32
    %0 = arith.cmpi eq, %arg0, %c0_i32 : i32
    %1 = arith.extui %0 : i1 to i32
    %c0_i32_0 = arith.constant 0 : i32
    %2 = arith.cmpi ne, %1, %c0_i32_0 : i32
    scf.if %2 {
      %cst_35 = arith.constant 0.000000e+00 : f32
      %92 = vector.broadcast %cst_35 : f32 to vector<2x8x256xf32>
      %c0_36 = arith.constant 0 : index
      %c0_37 = arith.constant 0 : index
      %c0_38 = arith.constant 0 : index
      %93 = vector.load %arg5[%c0_36, %c0_37, %c0_38] : memref<2x8x256xf32, #tpu.memory_space<vmem>>, vector<2x8x256xf32>
      tpu.vector_store %arg5[%c0_36, %c0_37, %c0_38], %92 {strides = array<i32>} : memref<2x8x256xf32, #tpu.memory_space<vmem>>, vector<2x8x256xf32>,
      %cst_39 = arith.constant 0.000000e+00 : f32
      %94 = vector.broadcast %cst_39 : f32 to vector<8x1xf32>
      %c0_40 = arith.constant 0 : index
      %c0_41 = arith.constant 0 : index
      %95 = vector.load %arg6[%c0_40, %c0_41] : memref<8x1xf32, #tpu.memory_space<vmem>>, vector<8x1xf32>
      tpu.vector_store %arg6[%c0_40, %c0_41], %94 {strides = array<i32>} : memref<8x1xf32, #tpu.memory_space<vmem>>, vector<8x1xf32>,
      %cst_42 = arith.constant 0.000000e+00 : f32
      %96 = vector.broadcast %cst_42 : f32 to vector<8x1xf32>
      %c0_43 = arith.constant 0 : index
      %c0_44 = arith.constant 0 : index
      %97 = vector.load %arg7[%c0_43, %c0_44] : memref<8x1xf32, #tpu.memory_space<vmem>>, vector<8x1xf32>
      tpu.vector_store %arg7[%c0_43, %c0_44], %96 {strides = array<i32>} : memref<8x1xf32, #tpu.memory_space<vmem>>, vector<8x1xf32>,
    } else {
    }
    %c0 = arith.constant 0 : index
    %c0_1 = arith.constant 0 : index
    %3 = vector.load %arg2[%c0, %c0_1] : memref<8x36xbf16, #tpu.memory_space<vmem>>, vector<8x36xbf16>
    %4 = tpu.iota {dimensions = array<i32: 1>} : vector<1x222xi32>
    %c16_i32 = arith.constant 16 : i32
    %c0_i32_2 = arith.constant 0 : i32
    %5 = arith.cmpi eq, %c16_i32, %c0_i32_2 : i32
    %c1_i32 = arith.constant 1 : i32
    %6 = arith.select %5, %c1_i32, %c16_i32 : i32
    %7 = vector.broadcast %6 : i32 to vector<1x222xi32>
    %8 = arith.remsi %4, %7 : vector<1x222xi32>
    %c0_i32_3 = arith.constant 0 : i32
    %9 = vector.broadcast %c0_i32_3 : i32 to vector<1x222xi32>
    %10 = arith.cmpi ne, %8, %9 : vector<1x222xi32>
    %c0_i32_4 = arith.constant 0 : i32
    %11 = vector.broadcast %c0_i32_4 : i32 to vector<1x222xi32>
    %12 = arith.cmpi slt, %8, %11 : vector<1x222xi32>
    %c0_i32_5 = arith.constant 0 : i32
    %13 = arith.cmpi slt, %6, %c0_i32_5 : i32
    %14 = vector.broadcast %13 : i1 to vector<1x222xi1>
    %15 = vector.broadcast %14 : vector<1x222xi1> to vector<1x222xi1>
    %16 = arith.xori %12, %15 : vector<1x222xi1>
    %17 = arith.andi %16, %10 : vector<1x222xi1>
    %18 = vector.broadcast %6 : i32 to vector<1x222xi32>
    %19 = arith.addi %8, %18 : vector<1x222xi32>
    %20 = arith.select %17, %19, %8 : vector<1x222xi1>, vector<1x222xi32>
    %c14_i32 = arith.constant 14 : i32
    %21 = vector.broadcast %c14_i32 : i32 to vector<1x222xi32>
    %22 = arith.cmpi slt, %20, %21 : vector<1x222xi32>
    %23 = arith.extui %22 : vector<1x222xi1> to vector<1x222xi32>
    %24 = arith.sitofp %23 : vector<1x222xi32> to vector<1x222xf32>
    %cst = arith.constant 0.000000e+00 : f32
    %25 = vector.broadcast %cst : f32 to vector<8x1xf32>
    %cst_6 = arith.constant 0.000000e+00 : f32
    %26 = vector.broadcast %cst_6 : f32 to vector<8x1xf32>
    %c0_7 = arith.constant 0 : index
    %c0_8 = arith.constant 0 : index
    %c0_9 = arith.constant 0 : index
    %27 = vector.load %arg1[%c0_7, %c0_8, %c0_9] : memref<2x4x256xf32, #tpu.memory_space<vmem>>, vector<1x4x256xf32>
    %28 = vector.shape_cast %27 : vector<1x4x256xf32> to vector<4x256xf32>
    %29 = arith.truncf %28 : vector<4x256xf32> to vector<4x256xbf16>
    %30 = vector.extract_strided_slice %29 {offsets = [0, 0], sizes = [4, 222], strides = [1, 1]} : vector<4x256xbf16> to vector<4x222xbf16>
    %31 = vector.extract_strided_slice %29 {offsets = [0, 1], sizes = [4, 222], strides = [1, 1]} : vector<4x256xbf16> to vector<4x222xbf16>
    %32 = vector.extract_strided_slice %29 {offsets = [0, 2], sizes = [4, 222], strides = [1, 1]} : vector<4x256xbf16> to vector<4x222xbf16>
    %33 = vector.extract_strided_slice %29 {offsets = [0, 16], sizes = [4, 222], strides = [1, 1]} : vector<4x256xbf16> to vector<4x222xbf16>
    %34 = vector.extract_strided_slice %29 {offsets = [0, 17], sizes = [4, 222], strides = [1, 1]} : vector<4x256xbf16> to vector<4x222xbf16>
    %35 = vector.extract_strided_slice %29 {offsets = [0, 18], sizes = [4, 222], strides = [1, 1]} : vector<4x256xbf16> to vector<4x222xbf16>
    %36 = vector.extract_strided_slice %29 {offsets = [0, 32], sizes = [4, 222], strides = [1, 1]} : vector<4x256xbf16> to vector<4x222xbf16>
    %37 = vector.extract_strided_slice %29 {offsets = [0, 33], sizes = [4, 222], strides = [1, 1]} : vector<4x256xbf16> to vector<4x222xbf16>
    %38 = vector.extract_strided_slice %29 {offsets = [0, 34], sizes = [4, 222], strides = [1, 1]} : vector<4x256xbf16> to vector<4x222xbf16>
    %39 = tpu.concatenate %30, %31, %32, %33, %34, %35, %36, %37, %38 in 0 : vector<4x222xbf16>, vector<4x222xbf16>, vector<4x222xbf16>, vector<4x222xbf16>, vector<4x222xbf16>, vector<4x222xbf16>, vector<4x222xbf16>, vector<4x222xbf16>, vector<4x222xbf16> -> vector<36x222xbf16>
    %cst_10 = arith.constant dense<0.000000e+00> : vector<8x222xf32>
    %40 = tpu.matmul %3, %39, %cst_10 {dimension_numbers = #tpu.dot_dimension_numbers<[1], [0], [0], [1], [0, 0, 1, 1], [], []>} : vector<8x36xbf16>, vector<36x222xbf16>, vector<8x222xf32> -> vector<8x222xf32>
    %41 = vector.broadcast %24 : vector<1x222xf32> to vector<8x222xf32>
    %42 = arith.mulf %40, %41 : vector<8x222xf32>
    %cst_11 = arith.constant dense<0.000000e+00> : vector<8xf32>
    %43 = vector.multi_reduction <add>, %42, %cst_11 [1] : vector<8x222xf32> to vector<8xf32>
    %44 = vector.shape_cast %43 : vector<8xf32> to vector<8x1xf32>
    %45 = arith.addf %25, %44 : vector<8x1xf32>
    %46 = arith.mulf %42, %42 : vector<8x222xf32>
    %cst_12 = arith.constant dense<0.000000e+00> : vector<8xf32>
    %47 = vector.multi_reduction <add>, %46, %cst_12 [1] : vector<8x222xf32> to vector<8xf32>
    %48 = vector.shape_cast %47 : vector<8xf32> to vector<8x1xf32>
    %49 = arith.addf %26, %48 : vector<8x1xf32>
    %50 = vector.shape_cast %40 : vector<8x222xf32> to vector<1x8x222xf32>
    %c2_i32 = arith.constant 2 : i32
    %51 = arith.muli %arg0, %c2_i32 : i32
    %c0_i32_13 = arith.constant 0 : i32
    %52 = arith.addi %51, %c0_i32_13 : i32
    %53 = arith.index_cast %52 : i32 to index
    %c0_14 = arith.constant 0 : index
    %c0_15 = arith.constant 0 : index
    %54 = vector.load %arg5[%53, %c0_14, %c0_15] : memref<2x8x256xf32, #tpu.memory_space<vmem>>, vector<1x8x222xf32>
    tpu.vector_store %arg5[%53, %c0_14, %c0_15], %50 {strides = array<i32>} : memref<2x8x256xf32, #tpu.memory_space<vmem>>, vector<1x8x222xf32>,
    %c1 = arith.constant 1 : index
    %c0_16 = arith.constant 0 : index
    %c0_17 = arith.constant 0 : index
    %55 = vector.load %arg1[%c1, %c0_16, %c0_17] : memref<2x4x256xf32, #tpu.memory_space<vmem>>, vector<1x4x256xf32>
    %56 = vector.shape_cast %55 : vector<1x4x256xf32> to vector<4x256xf32>
    %57 = arith.truncf %56 : vector<4x256xf32> to vector<4x256xbf16>
    %58 = vector.extract_strided_slice %57 {offsets = [0, 0], sizes = [4, 222], strides = [1, 1]} : vector<4x256xbf16> to vector<4x222xbf16>
    %59 = vector.extract_strided_slice %57 {offsets = [0, 1], sizes = [4, 222], strides = [1, 1]} : vector<4x256xbf16> to vector<4x222xbf16>
    %60 = vector.extract_strided_slice %57 {offsets = [0, 2], sizes = [4, 222], strides = [1, 1]} : vector<4x256xbf16> to vector<4x222xbf16>
    %61 = vector.extract_strided_slice %57 {offsets = [0, 16], sizes = [4, 222], strides = [1, 1]} : vector<4x256xbf16> to vector<4x222xbf16>
    %62 = vector.extract_strided_slice %57 {offsets = [0, 17], sizes = [4, 222], strides = [1, 1]} : vector<4x256xbf16> to vector<4x222xbf16>
    %63 = vector.extract_strided_slice %57 {offsets = [0, 18], sizes = [4, 222], strides = [1, 1]} : vector<4x256xbf16> to vector<4x222xbf16>
    %64 = vector.extract_strided_slice %57 {offsets = [0, 32], sizes = [4, 222], strides = [1, 1]} : vector<4x256xbf16> to vector<4x222xbf16>
    %65 = vector.extract_strided_slice %57 {offsets = [0, 33], sizes = [4, 222], strides = [1, 1]} : vector<4x256xbf16> to vector<4x222xbf16>
    %66 = vector.extract_strided_slice %57 {offsets = [0, 34], sizes = [4, 222], strides = [1, 1]} : vector<4x256xbf16> to vector<4x222xbf16>
    %67 = tpu.concatenate %58, %59, %60, %61, %62, %63, %64, %65, %66 in 0 : vector<4x222xbf16>, vector<4x222xbf16>, vector<4x222xbf16>, vector<4x222xbf16>, vector<4x222xbf16>, vector<4x222xbf16>, vector<4x222xbf16>, vector<4x222xbf16>, vector<4x222xbf16> -> vector<36x222xbf16>
    %cst_18 = arith.constant dense<0.000000e+00> : vector<8x222xf32>
    %68 = tpu.matmul %3, %67, %cst_18 {dimension_numbers = #tpu.dot_dimension_numbers<[1], [0], [0], [1], [0, 0, 1, 1], [], []>} : vector<8x36xbf16>, vector<36x222xbf16>, vector<8x222xf32> -> vector<8x222xf32>
    %69 = vector.broadcast %24 : vector<1x222xf32> to vector<8x222xf32>
    %70 = arith.mulf %68, %69 : vector<8x222xf32>
    %cst_19 = arith.constant dense<0.000000e+00> : vector<8xf32>
    %71 = vector.multi_reduction <add>, %70, %cst_19 [1] : vector<8x222xf32> to vector<8xf32>
    %72 = vector.shape_cast %71 : vector<8xf32> to vector<8x1xf32>
    %73 = arith.addf %45, %72 : vector<8x1xf32>
    %74 = arith.mulf %70, %70 : vector<8x222xf32>
    %cst_20 = arith.constant dense<0.000000e+00> : vector<8xf32>
    %75 = vector.multi_reduction <add>, %74, %cst_20 [1] : vector<8x222xf32> to vector<8xf32>
    %76 = vector.shape_cast %75 : vector<8xf32> to vector<8x1xf32>
    %77 = arith.addf %49, %76 : vector<8x1xf32>
    %78 = vector.shape_cast %68 : vector<8x222xf32> to vector<1x8x222xf32>
    %c2_i32_21 = arith.constant 2 : i32
    %79 = arith.muli %arg0, %c2_i32_21 : i32
    %c1_i32_22 = arith.constant 1 : i32
    %80 = arith.addi %79, %c1_i32_22 : i32
    %81 = arith.index_cast %80 : i32 to index
    %c0_23 = arith.constant 0 : index
    %c0_24 = arith.constant 0 : index
    %82 = vector.load %arg5[%81, %c0_23, %c0_24] : memref<2x8x256xf32, #tpu.memory_space<vmem>>, vector<1x8x222xf32>
    tpu.vector_store %arg5[%81, %c0_23, %c0_24], %78 {strides = array<i32>} : memref<2x8x256xf32, #tpu.memory_space<vmem>>, vector<1x8x222xf32>,
    %c0_25 = arith.constant 0 : index
    %c0_26 = arith.constant 0 : index
    %83 = vector.load %arg6[%c0_25, %c0_26] : memref<8x1xf32, #tpu.memory_space<vmem>>, vector<8x1xf32>
    %84 = arith.addf %83, %73 : vector<8x1xf32>
    %c0_27 = arith.constant 0 : index
    %c0_28 = arith.constant 0 : index
    %85 = vector.load %arg6[%c0_27, %c0_28] : memref<8x1xf32, #tpu.memory_space<vmem>>, vector<8x1xf32>
    tpu.vector_store %arg6[%c0_27, %c0_28], %84 {strides = array<i32>} : memref<8x1xf32, #tpu.memory_space<vmem>>, vector<8x1xf32>,
    %c0_29 = arith.constant 0 : index
    %c0_30 = arith.constant 0 : index
    %86 = vector.load %arg7[%c0_29, %c0_30] : memref<8x1xf32, #tpu.memory_space<vmem>>, vector<8x1xf32>
    %87 = arith.addf %86, %77 : vector<8x1xf32>
    %c0_31 = arith.constant 0 : index
    %c0_32 = arith.constant 0 : index
    %88 = vector.load %arg7[%c0_31, %c0_32] : memref<8x1xf32, #tpu.memory_space<vmem>>, vector<8x1xf32>
    tpu.vector_store %arg7[%c0_31, %c0_32], %87 {strides = array<i32>} : memref<8x1xf32, #tpu.memory_space<vmem>>, vector<8x1xf32>,
    %c0_i32_33 = arith.constant 0 : i32
    %89 = arith.cmpi eq, %arg0, %c0_i32_33 : i32
    %90 = arith.extui %89 : i1 to i32
    %c0_i32_34 = arith.constant 0 : i32
    %91 = arith.cmpi ne, %90, %c0_i32_34 : i32
    scf.if %91 {
      %c0_35 = arith.constant 0 : index
      %c0_36 = arith.constant 0 : index
      %92 = vector.load %arg6[%c0_35, %c0_36] : memref<8x1xf32, #tpu.memory_space<vmem>>, vector<8x1xf32>
      %cst_37 = arith.constant 0.00255102036 : f32
      %93 = vector.broadcast %cst_37 : f32 to vector<8x1xf32>
      %94 = arith.mulf %92, %93 : vector<8x1xf32>
      %c0_38 = arith.constant 0 : index
      %c0_39 = arith.constant 0 : index
      %95 = vector.load %arg7[%c0_38, %c0_39] : memref<8x1xf32, #tpu.memory_space<vmem>>, vector<8x1xf32>
      %cst_40 = arith.constant 0.00255102036 : f32
      %96 = vector.broadcast %cst_40 : f32 to vector<8x1xf32>
      %97 = arith.mulf %95, %96 : vector<8x1xf32>
      %98 = arith.mulf %94, %94 : vector<8x1xf32>
      %99 = arith.subf %97, %98 : vector<8x1xf32>
      %c0_41 = arith.constant 0 : index
      %c0_42 = arith.constant 0 : index
      %100 = vector.load %arg3[%c0_41, %c0_42] : memref<8x1xf32, #tpu.memory_space<vmem>>, vector<8x1xf32>
      %cst_43 = arith.constant 9.99999974E-6 : f32
      %101 = vector.broadcast %cst_43 : f32 to vector<8x1xf32>
      %102 = arith.addf %99, %101 : vector<8x1xf32>
      %103 = math.rsqrt %102 : vector<8x1xf32>
      %104 = arith.mulf %100, %103 : vector<8x1xf32>
      %c0_44 = arith.constant 0 : index
      %c0_45 = arith.constant 0 : index
      %105 = vector.load %arg4[%c0_44, %c0_45] : memref<8x1xf32, #tpu.memory_space<vmem>>, vector<8x1xf32>
      %106 = arith.mulf %94, %104 : vector<8x1xf32>
      %107 = arith.subf %105, %106 : vector<8x1xf32>
      %c0_46 = arith.constant 0 : index
      %c0_47 = arith.constant 0 : index
      %c0_48 = arith.constant 0 : index
      %108 = vector.load %arg5[%c0_46, %c0_47, %c0_48] : memref<2x8x256xf32, #tpu.memory_space<vmem>>, vector<2x8x256xf32>
      %109 = vector.shape_cast %104 : vector<8x1xf32> to vector<1x8x1xf32>
      %110 = vector.broadcast %109 : vector<1x8x1xf32> to vector<2x8x256xf32>
      %111 = arith.mulf %108, %110 : vector<2x8x256xf32>
      %112 = vector.shape_cast %107 : vector<8x1xf32> to vector<1x8x1xf32>
      %113 = vector.broadcast %112 : vector<1x8x1xf32> to vector<2x8x256xf32>
      %114 = arith.addf %111, %113 : vector<2x8x256xf32>
      %cst_49 = arith.constant 0.000000e+00 : f32
      %115 = vector.broadcast %cst_49 : f32 to vector<2x8x256xf32>
      %116 = arith.maximumf %114, %115 : vector<2x8x256xf32>
      %c0_50 = arith.constant 0 : index
      %c0_51 = arith.constant 0 : index
      %c0_52 = arith.constant 0 : index
      %117 = vector.load %arg5[%c0_50, %c0_51, %c0_52] : memref<2x8x256xf32, #tpu.memory_space<vmem>>, vector<2x8x256xf32>
      tpu.vector_store %arg5[%c0_50, %c0_51, %c0_52], %116 {strides = array<i32>} : memref<2x8x256xf32, #tpu.memory_space<vmem>>, vector<2x8x256xf32>,
    } else {
    }
    return
  }
  func.func @transform_0(%arg0: i32) -> (i32, i32, i32) {
    %c0_i32 = arith.constant 0 : i32
    %c0_i32_0 = arith.constant 0 : i32
    %c0_i32_1 = arith.constant 0 : i32
    return %arg0, %c0_i32, %c0_i32_0 : i32, i32, i32
  }
  func.func @transform_1(%arg0: i32) -> (i32, i32) {
    %c0_i32 = arith.constant 0 : i32
    %c0_i32_0 = arith.constant 0 : i32
    %c0_i32_1 = arith.constant 0 : i32
    return %c0_i32, %c0_i32_0 : i32, i32
  }
  func.func @transform_2(%arg0: i32) -> (i32, i32) {
    %c0_i32 = arith.constant 0 : i32
    %c0_i32_0 = arith.constant 0 : i32
    %c0_i32_1 = arith.constant 0 : i32
    return %c0_i32, %c0_i32_0 : i32, i32
  }
  func.func @transform_3(%arg0: i32) -> (i32, i32) {
    %c0_i32 = arith.constant 0 : i32
    %c0_i32_0 = arith.constant 0 : i32
    %c0_i32_1 = arith.constant 0 : i32
    return %c0_i32, %c0_i32_0 : i32, i32
  }
  func.func @transform_4(%arg0: i32) -> (i32, i32, i32) {
    %c0_i32 = arith.constant 0 : i32
    %c0_i32_0 = arith.constant 0 : i32
    %c0_i32_1 = arith.constant 0 : i32
    %c0_i32_2 = arith.constant 0 : i32
    return %c0_i32, %c0_i32_0, %c0_i32_1 : i32, i32, i32
  }
}

</mosaic_0001>

<bundles_post_ra>
// kernel: conv_block.1
= control target key start
LH: loop header
LB: loop body
LE: loop exit
PB: predicated region body
PF: predicated region fallthrough
CT: control target
= control target key end

     0   :  { %s452_s19 = smov 94   ;;  %s454_s20 = smov 110   ;;  %vm128_vm0 = vcmask 1041408   ;;  %vm126_vm1 = vcmask 769024   ;;  %vm108_vm2 = vcmask 900096   ;;  %vm102_vm3 = vcmask 908288   ;;  %s640_s0 = inlined_call_operand.vmem [shape: f32[2,4,256], index: 0, kind: input, shape index: {}]   ;;  %s641_s4 = inlined_call_operand.vmem [shape: f32[2,8,256], index: 4, kind: output, shape index: {}]   ;;  %s642_s1 = inlined_call_operand.vmem [shape: bf16[8,36], index: 1, kind: input, shape index: {}]   ;;  %s643_s2 = inlined_call_operand.vmem [shape: f32[8,1], index: 2, kind: input, shape index: {}]   ;;  %s644_s3 = inlined_call_operand.vmem [shape: f32[8,1], index: 3, kind: input, shape index: {}]  }
   0x1   :  { %v63_v0 = vld [vmem:[%s640_s0] sm:$0xff]  ;;  %v433_v1 = vld [vmem:[%s640_s0 + $0x8] sm:$0xff]  ;;  %s453_s0 = smov 111   ;;  %s455_s21 = smov 96   ;;  %vm114_vm4 = vcmask 785408   ;;  %vm135_vm5 = vcmask 1043456  }
   0x2   :  { %65 = vst [vmem:[#allocation1] ss:$2 sm:$0xff] %v63_v0  ;;  %s456_s22 = smov 95   ;;  %s457_s23 = smov 127   ;;  %vm120_vm6 = vcmask 777216   ;;  %vm140_vm7 = vcmask 1045504  }
   0x3   :  { %s458_s24 = smov 126   ;;  %s459_s25 = smov 112   ;;  %vm82_vm8 = vcmask 1039360   ;;  %vm88_vm9 = vcmask 1031168   ;;  %vm96_vm10 = vcmask 916480   ;;  %vm163_vm11 = vcmask 293888  }
   0x4   :  { %vm26_vm14 = vcmask 7168  }
   0x9   :  { %v66_v2 = vld.sshfl [vmem:[#allocation1] sm:$0xff pattern:$0x75316420]  ;;  %v67_v3 = vld.sshfl [vmem:[#allocation1 + $0x8] sm:$0xff pattern:$0x75316420] }
   0xa   :  { %v70_v4 = vpack.c.bf16 %v67_v3, %v66_v2  ;;  %223 = vst [vmem:[#allocation1] ss:$2 sm:$0xff] %v433_v1  ;;  %v460_v3 = vmov 0.0  }
   0xb   :  { %23 = vst [vmem:[%s641_s4 + $0x8] sm:$0xff] %v460_v3 }
   0xc   :  { %v72_v5 = vunpack.c.l.b16 %v70_v4  ;;  %v73_v6 = vunpack.c.h.b16 %v70_v4  ;;  %25 = vst [vmem:[%s641_s4 + $0x18] sm:$0xff] %v460_v3 }
   0xd   :  { %27 = vst.msk [vmem:[#allocation2] sm:$0xff] %vm26_vm14, %v460_v3 }
   0xe   :  { %v493_v7 = vpack.c.b16 %v72_v5, %v72_v5  ;;  %v495_v8 = vpack.c.b16 %v73_v6, %v73_v6  ;;  %28 = vst.msk [vmem:[#allocation3] sm:$0xff] %vm26_vm14, %v460_v3 }
  0x10   :  { %122 = vrot.lane.b32.xlu1 %v493_v7, %s452_s19  ;;  %124 = vrot.lane.b32.xlu2 %v495_v8, %s452_s19  ;;  %v77_v20 = vrot.slane %v495_v8, 6  ;;  %v76_v21 = vrot.slane %v493_v7, 6  ;;  %v91_v22 = vrot.slane %v495_v8, 2  ;;  %v90_v23 = vrot.slane %v493_v7, 2 }
  0x11   :  { %v224_v9 = vld.sshfl [vmem:[#allocation1] sm:$0xff pattern:$0x75316420]  ;;  %v225_v10 = vld.sshfl [vmem:[#allocation1 + $0x8] sm:$0xff pattern:$0x75316420] }
  0x12   :  { %v228_v11 = vpack.c.bf16 %v225_v10, %v224_v9 }
  0x14   :  { %v230_v12 = vunpack.c.l.b16 %v228_v11  ;;  %v231_v14 = vunpack.c.h.b16 %v228_v11 }
  0x16   :  { %v499_v13 = vpack.c.b16 %v230_v12, %v230_v12  ;;  %v504_v16 = vpack.c.b16 %v231_v14, %v231_v14 }
  0x18   :  { %273 = vrot.lane.b32.xlu0 %v499_v13, %s452_s19  ;;  %253 = vrot.lane.b32.xlu1 %v499_v13, %s453_s0  ;;  %v234_v15 = vrot.slane %v499_v13, 6  ;;  %v235_v17 = vrot.slane %v504_v16, 6  ;;  %v246_v18 = vrot.slane %v499_v13, 2  ;;  %v247_v19 = vrot.slane %v504_v16, 2 }
  0x1a   :  { %258 = vrot.lane.b32.xlu2 %v234_v15, %s454_s20 }
  0x20   :  { %275 = vrot.lane.b32.xlu0 %v504_v16, %s452_s19  ;;  %255 = vrot.lane.b32.xlu1 %v504_v16, %s453_s0 }
  0x22   :  { %260 = vrot.lane.b32.xlu2 %v235_v17, %s454_s20 }
  0x28   :  { %263 = vrot.lane.b32.xlu0 %v499_v13, %s455_s21  ;;  %265 = vrot.lane.b32.xlu1 %v504_v16, %s455_s21 }
  0x2a   :  { %268 = vrot.lane.b32.xlu2 %v246_v18, %s456_s22 }
  0x30   :  { %270 = vrot.lane.b32.xlu0 %v247_v19, %s456_s22  ;;  %238 = vrot.lane.b32.xlu1 %v235_v17, %s457_s23 }
  0x32   :  { %241 = vrot.lane.b32.xlu2 %v499_v13, %s458_s24 }
  0x38   :  { %236 = vrot.lane.b32.xlu0 %v234_v15, %s457_s23  ;;  %98 = vrot.lane.b32.xlu1 %v493_v7, %s453_s0 }
  0x3a   :  { %100 = vrot.lane.b32.xlu2 %v495_v8, %s453_s0 }
  0x40   :  { %243 = vrot.lane.b32.xlu0 %v504_v16, %s458_s24  ;;  %106 = vrot.lane.b32.xlu1 %v77_v20, %s454_s20 }
  0x42   :  { %248 = vrot.lane.b32.xlu2 %v246_v18, %s459_s25 }
  0x48   :  { %110 = vrot.lane.b32.xlu1 %v493_v7, %s455_s21  ;;  %104 = vrot.lane.b32.xlu0 %v76_v21, %s454_s20 }
  0x4a   :  { %112 = vrot.lane.b32.xlu2 %v495_v8, %s455_s21 }
  0x50   :  { %118 = vrot.lane.b32.xlu1 %v91_v22, %s456_s22  ;;  %250 = vrot.lane.b32.xlu0 %v247_v19, %s459_s25 }
  0x52   :  { %78 = vrot.lane.b32.xlu2 %v76_v21, %s457_s23 }
  0x58   :  { %116 = vrot.lane.b32.xlu0 %v90_v23, %s456_s22  ;;  %84 = vrot.lane.b32.xlu1 %v493_v7, %s458_s24 }
  0x5a   :  { %86 = vrot.lane.b32.xlu2 %v495_v8, %s458_s24 }
  0x60   :  { %80 = vrot.lane.b32.xlu0 %v77_v20, %s457_s23  ;;  %94 = vrot.lane.b32.xlu1 %v91_v22, %s459_s25 }
  0x68   :  { %92 = vrot.lane.b32.xlu0 %v90_v23, %s459_s25 }
  0x6a   :  { %v125_v24 = vpop.permute.xlu2 %124 }
  0x6b   :  { %v171_v25 = vsel %vm128_vm0, %v125_v24, 0 }
  0x6c   :  { %191 = vmatpush.bf16.msra.mxu1 %v171_v25 }
  0x74   :  { %v259_v27 = vpop.permute.xlu2 %258 }
  0x7c   :  { %v261_v32 = vpop.permute.xlu2 %260 }
  0x7d   :  { %v262_v41 = vsel %vm108_vm2, %v259_v27, %v261_v32 }
  0x82   :  { %v123_v26 = vpop.permute.xlu1 %122 }
  0x83   :  { %v127_v28 = vsel %vm126_vm1, %v123_v26, %v125_v24 }
  0x84   :  { %v168_v29 = vsel %vm128_vm0, %v127_v28, 0  ;;  %v269_v38 = vpop.permute.xlu2 %268 }
  0x85   :  { %178 = vmatpush.bf16.msra.mxu0 %v168_v29 }
  0x8a   :  { %v274_v30 = vpop.permute.xlu0 %273  ;;  %v254_v31 = vpop.permute.xlu1 %253 }
  0x8c   :  { %v242_v45 = vpop.permute.xlu2 %241 }
  0x92   :  { %v276_v33 = vpop.permute.xlu0 %275  ;;  %v256_v34 = vpop.permute.xlu1 %255 }
  0x93   :  { %v314_v35 = vsel %vm128_vm0, %v276_v33, 0  ;;  %v277_v36 = vsel %vm126_vm1, %v274_v30, %v276_v33  ;;  %v257_v42 = vsel %vm102_vm3, %v254_v31, %v256_v34  ;;  %v299_v43 = vsel %vm128_vm0, %v256_v34, %v261_v32 }
  0x94   :  { %334 = vmatpush.bf16.msra.mxu3 %v314_v35  ;;  %v311_v37 = vsel %vm128_vm0, %v277_v36, 0  ;;  %v296_v46 = vsel %vm128_vm0, %v257_v42, %v262_v41  ;;  %v101_v56 = vpop.permute.xlu2 %100 }
  0x95   :  { %321 = vmatpush.bf16.msra.mxu2 %v311_v37 }
  0x9a   :  { %v264_v39 = vpop.permute.xlu0 %263  ;;  %v266_v40 = vpop.permute.xlu1 %265 }
  0x9b   :  { %v267_v44 = vsel %vm114_vm4, %v264_v39, %v266_v40  ;;  %v303_v47 = vsel %vm135_vm5, %v299_v43, %v266_v40  ;;  %v30_v39 = vlaneseq }
  0x9c   :  { %v301_v52 = vsel %vm135_vm5, %v296_v46, %v267_v44  ;;  %v249_v59 = vpop.permute.xlu2 %248 }
  0x9d   :  { %v31_v40 = vand.u32 127, %v30_v39 }
  0x9f   :  { %v32_v41 = vadd.s32 128, %v31_v40  ;;  %v37_v43 = vand.u32 15, %v31_v40 }
  0xa1   :  { %v44_v42 = vand.u32 15, %v32_v41  ;;  %vm57_vm13 = vcmp.lt.s32.totalorder %v37_v43, 14 }
  0xa2   :  { %v271_v48 = vpop.permute.xlu0 %270  ;;  %v239_v49 = vpop.permute.xlu1 %238  ;;  %v429_v44 = vsel %vm57_vm13, 1.0, %v460_v3 }
  0xa3   :  { %v272_v50 = vsel %vm120_vm6, %v269_v38, %v271_v48  ;;  %v308_v51 = vsel %vm140_vm7, %v303_v47, %v271_v48  ;;  %v283_v2 = vsel %vm128_vm0, %v504_v16, %v239_v49  ;;  %v29_v16 = vld [vmem:[%s642_s1] sm:$0xf]  ;;  %vm58_vm12 = vcmp.lt.s32.totalorder %v44_v42, 14 }
  0xa4   :  { %335 = vmatpush.bf16.msra.mxu3 %v308_v51  ;;  %v305_v53 = vsel %vm140_vm7, %v301_v52, %v272_v50  ;;  %v113_v0 = vpop.permute.xlu2 %112 }
  0xa5   :  { %322 = vmatpush.bf16.msra.mxu2 %v305_v53 }
  0xaa   :  { %v237_v54 = vpop.permute.xlu0 %236  ;;  %v99_v55 = vpop.permute.xlu1 %98 }
  0xab   :  { %v240_v62 = vsel %vm82_vm8, %v237_v54, %v239_v49  ;;  %v103_v18 = vsel %vm102_vm3, %v99_v55, %v101_v56 }
  0xac   :  { %v280_v4 = vsel %vm128_vm0, %v499_v13, %v240_v62  ;;  %v79_v19 = vpop.permute.xlu2 %78 }
  0xb2   :  { %v244_v57 = vpop.permute.xlu0 %243  ;;  %v107_v58 = vpop.permute.xlu1 %106 }
  0xb3   :  { %v152_v63 = vsel %vm128_vm0, %v101_v56, %v107_v58  ;;  %v245_v1 = vsel %vm88_vm9, %v242_v45, %v244_v57  ;;  %v287_v5 = vsel %vm135_vm5, %v283_v2, %v244_v57 }
  0xb4   :  { %v156_v6 = vsel %vm135_vm5, %v152_v63, %v113_v0  ;;  %v285_v15 = vsel %vm135_vm5, %v280_v4, %v245_v1  ;;  %v87_v27 = vpop.permute.xlu2 %86 }
  0xba   :  { %v111_v60 = vpop.permute.xlu1 %110  ;;  %v105_v61 = vpop.permute.xlu0 %104 }
  0xbb   :  { %v109_v17 = vsel %vm108_vm2, %v105_v61, %v107_v58  ;;  %v115_v20 = vsel %vm114_vm4, %v111_v60, %v113_v0 }
  0xbc   :  { %v149_v21 = vsel %vm128_vm0, %v103_v18, %v109_v17 }
  0xbd   :  { %v154_v25 = vsel %vm135_vm5, %v149_v21, %v115_v20 }
  0xc2   :  { %v119_v9 = vpop.permute.xlu1 %118  ;;  %v251_v10 = vpop.permute.xlu0 %250 }
  0xc3   :  { %v252_v11 = vsel %vm96_vm10, %v249_v59, %v251_v10  ;;  %v161_v12 = vsel %vm140_vm7, %v156_v6, %v119_v9  ;;  %v292_v14 = vsel %vm140_vm7, %v287_v5, %v251_v10  ;;  %v461_v6 = vmov 0  }
  0xc4   :  { %192 = vmatpush.bf16.msra.mxu1 %v161_v12  ;;  %336 = vmatpush.bf16.msra.mxu3 %v292_v14  ;;  %v289_v13 = vsel %vm140_vm7, %v285_v15, %v252_v11  ;;  %v362_v11 = vld [vmem:[#allocation2] sm:$0xff] }
  0xc5   :  { %323 = vmatpush.bf16.msra.mxu2 %v289_v13  ;;  %448 = vset.pattern.permute.xlu2 %v461_v6  ;;  %v366_v13 = vld [vmem:[#allocation3] sm:$0xff] }
  0xc6   :  { %449 = vset.pattern.permute.xlu0 %v461_v6 }
  0xc7   :  { %435 = vmatmul.msk.bf16.vlgmr.msra.gmra.mxu3 %vm163_vm11, %v29_v16 }
  0xc8   :  { %434 = vmatmul.msk.bf16.vlgmr.msra.gmra.mxu2 %vm163_vm11, %v29_v16 }
  0xca   :  { %v117_v22 = vpop.permute.xlu0 %116  ;;  %v85_v23 = vpop.permute.xlu1 %84 }
  0xcb   :  { %v121_v24 = vsel %vm120_vm6, %v117_v22, %v119_v9  ;;  %v89_v34 = vsel %vm88_vm9, %v85_v23, %v87_v27 }
  0xcc   :  { %v158_v26 = vsel %vm140_vm7, %v154_v25, %v121_v24 }
  0xcd   :  { %179 = vmatpush.bf16.msra.mxu0 %v158_v26 }
  0xd2   :  { %v81_v28 = vpop.permute.xlu0 %80  ;;  %v95_v29 = vpop.permute.xlu1 %94 }
  0xd3   :  { %v134_v30 = vsel %vm128_vm0, %v495_v8, %v81_v28  ;;  %v83_v32 = vsel %vm82_vm8, %v79_v19, %v81_v28 }
  0xd4   :  { %v139_v31 = vsel %vm135_vm5, %v134_v30, %v87_v27  ;;  %v131_v35 = vsel %vm128_vm0, %v493_v7, %v83_v32  ;;  %v430_v7 = vsel %vm58_vm12, 1.0, %v460_v3  ;;  %v378_v30 = vld [vmem:[%s643_s2] sm:$0xff] }
  0xd5   :  { %v145_v33 = vsel %vm140_vm7, %v139_v31, %v95_v29  ;;  %v137_v38 = vsel %vm135_vm5, %v131_v35, %v89_v34  ;;  %v391_v34 = vld [vmem:[%s644_s3] sm:$0xff] }
  0xd6   :  { %193 = vmatpush.bf16.msra.mxu1 %v145_v33 }
  0xd9   :  { %432 = vmatmul.msk.bf16.vlgmr.msra.gmra.mxu1 %vm163_vm11, %v29_v16 }
  0xda   :  { %v93_v36 = vpop.permute.xlu0 %92 }
  0xdb   :  { %v97_v37 = vsel %vm96_vm10, %v93_v36, %v95_v29 }
  0xdc   :  { %v142_v8 = vsel %vm140_vm7, %v137_v38, %v97_v37 }
  0xdd   :  { %180 = vmatpush.bf16.msra.mxu0 %v142_v8 }
  0xe0   :  { %431 = vmatmul.msk.bf16.vlgmr.msra.gmra.mxu0 %vm163_vm11, %v29_v16 }
 0x14a   :  { %v338_v45 = vpop.f32.mrf.mxu3 }
 0x14b   :  { %v343_v46 = vmul.f32 %v430_v7, %v338_v45  ;;  %437 = vst.msk [vmem:[%s641_s4 + $0x18] sm:$0xff] %vm126_vm1, %v338_v45  ;;  %v594_v47 = vpop.f32.mrf.mxu2 }
 0x14c   :  { %v342_v48 = vmul.f32 %v429_v44, %v594_v47 }
 0x14d   :  { %v344_v49 = vsel %vm126_vm1, %v343_v46, 0.0  ;;  %v350_v60 = vmul.f32 %v343_v46, %v343_v46 }
 0x14e   :  { %v345_v50 = vadd.f32 %v344_v49, %v342_v48  ;;  %v349_v1 = vmul.f32 %v342_v48, %v342_v48 }
 0x14f   :  { %v351_v2 = vsel %vm126_vm1, %v350_v60, 0.0 }
 0x150   :  { %346 = vadd.xlane.f32.xlu0 %v345_v50  ;;  %v352_v5 = vadd.f32 %v351_v2, %v349_v1 }
 0x152   :  { %v340_v51 = vpop.f32.mrf.mxu3  ;;  %v397_v8 = vld [vmem:[%s641_s4 + $0x18] sm:$0xff] }
 0x153   :  { %v327_v52 = vpop.f32.mrf.mxu2 }
 0x156   :  { %v195_v53 = vpop.f32.mrf.mxu1 }
 0x157   :  { %v200_v54 = vmul.f32 %v430_v7, %v195_v53  ;;  %219 = vst.msk [vmem:[%s641_s4 + $0x8] sm:$0xff] %vm126_vm1, %v195_v53 }
 0x159   :  { %v208_v55 = vmul.f32 %v200_v54, %v200_v54  ;;  %v202_v57 = vsel %vm126_vm1, %v200_v54, 0.0 }
 0x15b   :  { %v209_v61 = vsel %vm126_vm1, %v208_v55, 0.0 }
 0x15d   :  { %v602_v56 = vpop.f32.mrf.mxu0 }
 0x15e   :  { %v199_v58 = vmul.f32 %v429_v44, %v602_v56  ;;  %v197_v59 = vpop.f32.mrf.mxu1  ;;  %v395_v38 = vld [vmem:[%s641_s4 + $0x8] sm:$0xff] }
 0x160   :  { %v203_v62 = vadd.f32 %v202_v57, %v199_v58  ;;  %v207_v63 = vmul.f32 %v199_v58, %v199_v58 }
 0x162   :  { %204 = vadd.xlane.f32.xlu2 %v203_v62  ;;  %v210_v0 = vadd.f32 %v209_v61, %v207_v63 }
 0x164   :  { %211 = vadd.xlane.f32.xlu1 %v210_v0 }
 0x165   :  { %v184_v4 = vpop.f32.mrf.mxu0 }
 0x16a   :  { %353 = vadd.xlane.f32.xlu2 %v352_v5 }
 0x1c3   :  { %v347_v9 = vpop.xlane.xlu0 %346 }
 0x1d5   :  { %v205_v10 = vpop.xlane.xlu2 %204 }
 0x1d6   :  { %v348_v12 = vadd.f32 %v347_v9, %v205_v10 }
 0x1d7   :  { %v212_v15 = vpop.xlane.xlu1 %211 }
 0x1d8   :  { %v363_v14 = vadd.f32 %v362_v11, %v348_v12 }
 0x1da   :  { %365 = vst.msk [vmem:[#allocation2] sm:$0xff] %vm26_vm14, %v363_v14 }
 0x1dd   :  { %v354_v16 = vpop.xlane.xlu2 %353 }
 0x1de   :  { %v355_v17 = vadd.f32 %v354_v16, %v212_v15 }
 0x1e0   :  { %v367_v18 = vadd.f32 %v366_v13, %v355_v17 }
 0x1e1   :  { %v372_v19 = vld [vmem:[#allocation2] sm:$0xff] }
 0x1e2   :  { %368 = vst.msk [vmem:[#allocation3] sm:$0xff] %vm26_vm14, %v367_v18  ;;  %v373_v20 = vmul.f32 0.0025510204, %v372_v19 }
 0x1e4   :  { %v376_v22 = vmul.f32 %v373_v20, %v373_v20 }
 0x1e9   :  { %v374_v3 = vld [vmem:[#allocation3] sm:$0xff] }
 0x1ea   :  { %v375_v21 = vmul.f32 0.0025510204, %v374_v3 }
 0x1ec   :  { %v377_v23 = vsub.f32 %v375_v21, %v376_v22 }
 0x1ee   :  { %v379_v24 = vadd.f32 1e-05, %v377_v23 }
 0x1f0   :  { %450 = vrsqrt.f32 %v379_v24  ;;  %vm386_vm0 = vweird.f32 %v379_v24 }
 0x1f6   :  { %v451_v25 = vpop.eup %450 }
 0x1f7   :  { %v381_v26 = vmul.f32 %v451_v25, %v379_v24  ;;  %vm387_vm15 = vweird.f32 %v451_v25 }
 0x1f8   :  { %vm388_vm1 = vmor %vm386_vm0, %vm387_vm15 }
 0x1f9   :  { %v382_v27 = vmul.f32 %v451_v25, %v381_v26 }
 0x1fb   :  { %v383_v28 = vmul.f32 0.5, %v382_v27 }
 0x1fd   :  { %v384_v29 = vsub.f32 1.5, %v383_v28 }
 0x1ff   :  { %v385_v31 = vmul.f32 %v451_v25, %v384_v29 }
 0x201   :  { %v389_v32 = vsel %vm388_vm1, %v451_v25, %v385_v31 }
 0x202   :  { %v390_v33 = vmul.f32 %v389_v32, %v378_v30 }
 0x204   :  { %400 = vperm.xlu2 %448, %v390_v33   ;;  %v392_v35 = vmul.f32 %v390_v33, %v373_v20 }
 0x206   :  { %v393_v36 = vsub.f32 %v391_v34, %v392_v35 }
 0x208   :  { %409 = vperm.xlu0 %449, %v393_v36  }
 0x25e   :  { %v401_v37 = vpop.permute.xlu2 %400 }
 0x25f   :  { %v403_v39 = vmul.f32 %v401_v37, %v602_v56  ;;  %v404_v40 = vmul.f32 %v401_v37, %v395_v38  ;;  %v405_v41 = vmul.f32 %v401_v37, %v594_v47  ;;  %v406_v42 = vmul.f32 %v401_v37, %v397_v8 }
 0x27a   :  { %v410_v43 = vpop.permute.xlu0 %409 }
 0x27b   :  { %v412_v7 = vadd.f32 %v410_v43, %v403_v39  ;;  %v413_v44 = vadd.f32 %v410_v43, %v404_v40  ;;  %v414_v45 = vadd.f32 %v410_v43, %v405_v41  ;;  %v415_v46 = vadd.f32 %v410_v43, %v406_v42 }
 0x27d   :  { %v416_v48 = vmax.f32 %v412_v7, 0.0  ;;  %v417_v49 = vmax.f32 %v413_v44, 0.0  ;;  %v418_v50 = vmax.f32 %v414_v45, 0.0  ;;  %v419_v51 = vmax.f32 %v415_v46, 0.0 }
 0x27f   :  { %420 = vst [vmem:[%s641_s4] sm:$0xff] %v416_v48 }
 0x280   :  { %421 = vst [vmem:[%s641_s4 + $0x8] sm:$0xff] %v417_v49 }
 0x281   :  { %422 = vst [vmem:[%s641_s4 + $0x10] sm:$0xff] %v418_v50 }
 0x282   :  { %423 = vst [vmem:[%s641_s4 + $0x18] sm:$0xff] %v419_v51 }

</bundles_post_ra>
